<compile_context>
chip_gen: v7x
topology: tpu7x:2x2x1
jax: 0.10.0
libtpu: 0.0.40
codegen_flags: <defaults>
</compile_context>

<pallas_src>
import jax
import jax.numpy as jnp
from jax.experimental import pallas as pl
from jax.experimental.pallas import tpu as pltpu


# TODO(synk): AFPN.forward is abstract (raises NotImplementedError) in the
# reference module; no head computation exists to port.  The kernel below is
# a faithful "no-op" forward (identity on both feature maps) so the Pallas
# scaffolding is real and runnable, not a fabricated correlation head.
def _afpn_passthrough_kernel(z_ref, x_ref, z_out_ref, x_out_ref):
    # Whole-array VMEM copy (single block, lane-dense (N, C*H*W) layout).
    z_out_ref[...] = z_ref[...]
    x_out_ref[...] = x_ref[...]


@jax.jit
def afpn_passthrough(z_f, x_f):
    """Pallas identity pass over the two AFPN inputs (template + search)."""
    n = z_f.shape[0]
    assert x_f.shape[0] == n, "batch dims of z_f and x_f must match"
    z_shape, x_shape = z_f.shape, x_f.shape
    fz = z_shape[1] * z_shape[2] * z_shape[3]   # 4*8*8   = 256  (mult. of 128)
    fx = x_shape[1] * x_shape[2] * x_shape[3]   # 4*16*16 = 1024 (mult. of 128)

    # Lane-dense 2-D views; last dim is a multiple of 128 for both arrays.
    z2 = z_f.reshape(n, fz)
    x2 = x_f.reshape(n, fx)

    vmem = pltpu.MemorySpace.VMEM
    z_out2, x_out2 = pl.pallas_call(
        _afpn_passthrough_kernel,
        out_shape=(
            jax.ShapeDtypeStruct((n, fz), z_f.dtype),
            jax.ShapeDtypeStruct((n, fx), x_f.dtype),
        ),
        # No grid: kernel runs once with the full (N, C*H*W) arrays in VMEM.
        in_specs=[
            pl.BlockSpec(memory_space=vmem),
            pl.BlockSpec(memory_space=vmem),
        ],
        out_specs=(
            pl.BlockSpec(memory_space=vmem),
            pl.BlockSpec(memory_space=vmem),
        ),
        # Outputs alias the (intermediate, reshaped) inputs: no extra HBM
        # round trip for this pure-copy path.
        input_output_aliases={0: 0, 1: 1},
    )(z2, x2)

    return z_out2.reshape(z_shape), x_out2.reshape(x_shape)


def afpn_forward(z_f, x_f):
    """Exact semantic mirror of the PyTorch AFPN.forward (abstract)."""
    raise NotImplementedError


if __name__ == "__main__":
    key = jax.random.PRNGKey(0)
    kz, kx = jax.random.split(key)

    # Typical siamese-tracker shapes at SMALL scale:
    #   z_f: template features  (batch=2, channels=4, 8x8)
    #   x_f: search   features  (batch=2, channels=4, 16x16)
    z_f = jax.random.normal(kz, (2, 4, 8, 8), dtype=jnp.float32)
    x_f = jax.random.normal(kx, (2, 4, 16, 16), dtype=jnp.float32)

    # Semantics check: the base-class forward is abstract.
    try:
        afpn_forward(z_f, x_f)
        raise AssertionError("AFPN.forward should raise NotImplementedError")
    except NotImplementedError:
        pass

    # Run the Pallas kernel (no-op forward) and verify it on-device.
    z_out, x_out = afpn_passthrough(z_f, x_f)
    jax.block_until_ready((z_out, x_out))

    assert z_out.shape == z_f.shape and z_out.dtype == z_f.dtype
    assert x_out.shape == x_f.shape and x_out.dtype == x_f.dtype
    assert bool(jnp.all(z_out == z_f)) and bool(jnp.all(x_out == x_f))

    print("KERNEL_OK")
</pallas_src>

<mosaic_0001>
module attributes {stable_mosaic.version = 11 : i64} {
  func.func @_afpn_passthrough_kernel(%arg0: memref<2x256xf32, #tpu.memory_space<vmem>>, %arg1: memref<2x1024xf32, #tpu.memory_space<vmem>>, %arg2: memref<2x256xf32, #tpu.memory_space<vmem>>, %arg3: memref<2x1024xf32, #tpu.memory_space<vmem>>) attributes {dimension_semantics = [], scalar_prefetch = 0 : i64, scratch_operands = 0 : i64, tpu.core_type = #tpu.core_type<tc>} {
    %c0 = arith.constant 0 : index
    %c0_0 = arith.constant 0 : index
    %0 = vector.load %arg0[%c0, %c0_0] : memref<2x256xf32, #tpu.memory_space<vmem>>, vector<2x256xf32>
    %c0_1 = arith.constant 0 : index
    %c0_2 = arith.constant 0 : index
    %1 = vector.load %arg2[%c0_1, %c0_2] : memref<2x256xf32, #tpu.memory_space<vmem>>, vector<2x256xf32>
    tpu.vector_store %arg2[%c0_1, %c0_2], %0 {strides = array<i32>} : memref<2x256xf32, #tpu.memory_space<vmem>>, vector<2x256xf32>,
    %c0_3 = arith.constant 0 : index
    %c0_4 = arith.constant 0 : index
    %2 = vector.load %arg1[%c0_3, %c0_4] : memref<2x1024xf32, #tpu.memory_space<vmem>>, vector<2x1024xf32>
    %c0_5 = arith.constant 0 : index
    %c0_6 = arith.constant 0 : index
    %3 = vector.load %arg3[%c0_5, %c0_6] : memref<2x1024xf32, #tpu.memory_space<vmem>>, vector<2x1024xf32>
    tpu.vector_store %arg3[%c0_5, %c0_6], %2 {strides = array<i32>} : memref<2x1024xf32, #tpu.memory_space<vmem>>, vector<2x1024xf32>,
    return
  }
}

</mosaic_0001>

<bundles_post_ra>
// kernel: afpn_passthrough.1
= control target key start
LH: loop header
LB: loop body
LE: loop exit
PB: predicated region body
PF: predicated region fallthrough
CT: control target
= control target key end

     0   :  { %s65_s0 = inlined_call_operand.vmem [shape: f32[2,256], index: 0, kind: input, shape index: {}, may-alias: {0,2}]   ;;  %s66_s2 = inlined_call_operand.vmem [shape: f32[2,256], index: 2, kind: output, shape index: {0}, may-alias: {0,2}]   ;;  %s67_s1 = inlined_call_operand.vmem [shape: f32[2,1024], index: 1, kind: input, shape index: {}, may-alias: {1,3}]   ;;  %s68_s3 = inlined_call_operand.vmem [shape: f32[2,1024], index: 3, kind: output, shape index: {1}, may-alias: {1,3}]  }
   0x1   :  { %v13_v0 = vld [vmem:[%s65_s0] sm:$0xf]  ;;  %v16_v2 = vld [vmem:[%s67_s1 + $0x8] sm:$0xff] }
   0x2   :  { %v15_v1 = vld [vmem:[%s67_s1] sm:$0xff]  ;;  %14 = vst [vmem:[%s66_s2] sm:$0xf] %v13_v0 }
   0x3   :  { %17 = vst [vmem:[%s68_s3] sm:$0xff] %v15_v1  ;;  %18 = vst [vmem:[%s68_s3 + $0x8] sm:$0xff] %v16_v2 }

</bundles_post_ra>
